<compile_context>
chip_gen: v5e
topology: v5e:2x2
jax: 0.10.0
libtpu: 0.0.40
codegen_flags: <defaults>
</compile_context>

<pallas_src>
import functools

import numpy as np

import jax
import jax.numpy as jnp
from jax.experimental import pallas as pl
from jax.experimental.pallas import tpu as pltpu

EPS = 1e-4

_SINGLE_SHOT_MAX_B = 256    # above this, tile the batch over a grid axis
_DEFAULT_BLOCK_B = 256      # per-step batch tile (multiple of 8); vreg-pressure bound


def _pi_0(x):
    return (1.0 - EPS) * x + EPS


def _pi_1(x):
    return (1.0 - EPS) * x


def _static_int_pow(x, n: int):
    """x ** n for a static python int n >= 1, via explicit multiplies (VPU only)."""
    assert n >= 1
    result = None
    base = x
    while True:
        if n & 1:
            result = base if result is None else result * base
        n >>= 1
        if n == 0:
            return result
        base = base * base


@functools.lru_cache(maxsize=None)
def _pair_tables(C: int, task: str):
    """Static per-task tables over the flattened (c1, c2) pair grid, j = c1*C + c2.

    Returns:
      tab      : (3, C, C*C) f32.  tab[0] = task target f(c1, c2) broadcast to C rows,
                 tab[1] = G1 one-hot gather matrix (G1[c, j] = [c1(j) == c]),
                 tab[2] = G2 one-hot gather matrix (G2[c, j] = [c2(j) == c]).
      inv_cnt  : (max_target + 1,) f32 guarded 1/count lookup table (0 when count == 0).
    """
    j = np.arange(C * C, dtype=np.int64)
    c1, c2 = j // C, j % C
    if task == "addition":
        tgt = c1 + c2
    elif task == "product":
        tgt = c1 * c2
    elif task == "multiop":
        tgt = c1 * c1 + c2 * c2 + c1 * c2
    else:
        raise ValueError(f"unsupported task: {task!r}")
    g1 = (c1[None, :] == np.arange(C)[:, None]).astype(np.float32)      # (C, CC)
    g2 = (c2[None, :] == np.arange(C)[:, None]).astype(np.float32)      # (C, CC)
    tgt_row = np.broadcast_to(tgt.astype(np.float32)[None, :], (C, C * C))
    tab = np.stack([tgt_row, g1, g2]).astype(np.float32)                # (3, C, CC)
    cnt = np.bincount(tgt).astype(np.float32)
    inv_cnt = np.where(cnt > 0.0, 1.0 / np.maximum(cnt, 1.0), 0.0).astype(np.float32)
    return tab, inv_cnt


# ---------------------------------------------------------------------------
# Shared in-kernel math on a (rows, C) tile  ->  per-row squared error (rows, 1)
# ---------------------------------------------------------------------------
def _pairwise_err(p1, p2, side, tgt, g1, g2, grade):
    lbl = side[:, 0:1]          # (R, 1) f32 label (small ints exact in f32)
    inv_cnt = side[:, 1:2]      # (R, 1) f32 guarded 1/count (0 when the label is empty)

    # pi_0 on the narrow (R, C) tiles, THEN the pair expansion.
    u = _pi_0(p1)
    v = _pi_0(p2)

    # One-hot gather on the MXU: a1[i, j] = u[i, c1(j)], a2[i, j] = v[i, c2(j)].
    # Keep f32 operands (exact 0/1 gather matrix; Mosaic f32 matmul stays accurate).
    a1 = jnp.dot(u, g1, preferred_element_type=jnp.float32)             # (R, CC)
    a2 = jnp.dot(v, g2, preferred_element_type=jnp.float32)             # (R, CC)

    # AndProd (stable), then Exists' stable pi_0, then ^grade (static int multiplies).
    xs = _static_int_pow(_pi_0(a1 * a2), grade)                         # (R, CC)

    # Guarded p-mean over the pair grid; 1/count is the hoisted per-label LUT value.
    mask = tgt == lbl                                                   # (R, CC)
    num = jnp.sum(jnp.where(mask, xs, 0.0), axis=1, keepdims=True)      # (R, 1)
    has = inv_cnt > 0.0
    pm = num * inv_cnt
    if grade == 1:
        root = pm
    elif grade == 2:
        root = jnp.sqrt(pm)
    else:
        root = jnp.exp(jnp.log(jnp.where(has, pm, 1.0)) * (1.0 / grade))
    exists = jnp.where(has, root, 0.0)        # empty mask -> 0 ('e' quantifier)
    d = 1.0 - _pi_1(exists)
    return d * d                               # (R, 1)


# ---------------------------------------------------------------------------
# Kernels
# ---------------------------------------------------------------------------
def _sat_agg_kernel(tab_ref, p1_ref, p2_ref, side_ref, out_ref, *, grade):
    tgt = tab_ref[0][0:1, :]      # (1, CC)
    g1 = tab_ref[1]               # (C, CC)
    g2 = tab_ref[2]               # (C, CC)
    err = _pairwise_err(p1_ref[...], p2_ref[...], side_ref[...], tgt, g1, g2, grade)
    out_ref[...] = jnp.sum(err, axis=0, keepdims=True)


def _sat_agg_kernel_tiled(tab_ref, p1_ref, p2_ref, side_ref, out_ref, acc_ref, *, grade):
    @pl.when(pl.program_id(1) == 0)
    def _():
        acc_ref[...] = jnp.zeros_like(acc_ref)

    tgt = tab_ref[0][0:1, :]
    g1 = tab_ref[1]
    g2 = tab_ref[2]
    err = _pairwise_err(p1_ref[...], p2_ref[...], side_ref[...], tgt, g1, g2, grade)
    acc_ref[...] += jnp.sum(err, axis=0, keepdims=True)

    @pl.when(pl.program_id(1) == pl.num_programs(1) - 1)
    def _():
        out_ref[...] = jnp.broadcast_to(
            jnp.reshape(acc_ref[...], (1, 1, 1)), out_ref.shape)


# ---------------------------------------------------------------------------
# Wrapper
# ---------------------------------------------------------------------------
@functools.partial(jax.jit, static_argnames=("grade", "task", "block_b"))
def sat_agg_loss_pallas(p1, p2, labels, grade, task, block_b=None):
    """loss = 1 - sat_agg, computed in a Pallas TPU kernel."""
    p1 = p1.astype(jnp.float32)
    p2 = p2.astype(jnp.float32)
    B, C = p1.shape
    CC = C * C
    grade = int(grade)

    tab_np, inv_np = _pair_tables(C, task)
    max_t = inv_np.shape[0] - 1
    tab = jnp.asarray(tab_np)                             # (3, C, CC) f32
    inv_lut = jnp.asarray(inv_np)                         # (max_t + 1,) f32

    labels = labels.astype(jnp.int32).reshape(B)
    valid = (labels >= 0) & (labels <= max_t)
    inv_cnt = jnp.where(valid, inv_lut[jnp.clip(labels, 0, max_t)], 0.0)
    side = jnp.stack([labels.astype(jnp.float32), inv_cnt], axis=1)    # (B, 2) f32

    if block_b is None and B > _SINGLE_SHOT_MAX_B:
        block_b = _DEFAULT_BLOCK_B

    if block_b is None:
        # Small batch: one grid-less invocation, whole problem resident in VMEM.
        kernel = functools.partial(_sat_agg_kernel, grade=grade)
        ssum = pl.pallas_call(
            kernel,
            out_shape=jax.ShapeDtypeStruct((1, 1), jnp.float32),
            in_specs=[pl.BlockSpec(memory_space=pltpu.MemorySpace.VMEM)] * 4,
            out_specs=pl.BlockSpec(memory_space=pltpu.MemorySpace.VMEM),
        )(tab, p1, p2, side)
        return jnp.sqrt(ssum[0, 0] / B)

    # Large batch: tile B over an "arbitrary" grid axis with a (1,1) accumulator, and a
    # leading size-2 "parallel" axis so both v7x TensorCores each reduce half the batch
    # (harmless two-pass accumulation on single-core v5e/v6e).
    bt = int(block_b)
    if bt % 8 != 0:
        raise ValueError("block_b must be a multiple of 8")
    blocks = -(-B // bt)
    n_par = 2 if blocks >= 2 else 1
    n_blk = -(-blocks // n_par)
    b_pad = n_par * n_blk * bt
    pad = b_pad - B
    if pad:
        # Padded rows have inv_cnt = 0  ->  exists = 0  ->  err = exactly 1.0 each.
        p1 = jnp.pad(p1, ((0, pad), (0, 0)))
        p2 = jnp.pad(p2, ((0, pad), (0, 0)))
        side = jnp.pad(side, ((0, pad), (0, 0)))

    kernel = functools.partial(_sat_agg_kernel_tiled, grade=grade)
    out = pl.pallas_call(
        kernel,
        grid=(n_par, n_blk),
        out_shape=jax.ShapeDtypeStruct((n_par, 8, 128), jnp.float32),
        in_specs=[
            pl.BlockSpec((3, C, CC), lambda c, i: (0, 0, 0)),
            pl.BlockSpec((bt, C), lambda c, i: (c * n_blk + i, 0)),
            pl.BlockSpec((bt, C), lambda c, i: (c * n_blk + i, 0)),
            pl.BlockSpec((bt, 2), lambda c, i: (c * n_blk + i, 0)),
        ],
        out_specs=pl.BlockSpec((1, 8, 128), lambda c, i: (c, 0, 0)),
        scratch_shapes=[pltpu.VMEM((1, 1), jnp.float32)],
        compiler_params=pltpu.CompilerParams(
            dimension_semantics=("parallel", "arbitrary")),
    )(tab, p1, p2, side)

    total = jnp.sum(out[:, 0, 0])
    return jnp.sqrt((total - pad) / B)


# ---------------------------------------------------------------------------
# Pure-JAX reference (mirrors LTNtorch semantics) for correctness check.
# ---------------------------------------------------------------------------
def sat_agg_loss_ref(p1, p2, labels, grade, task):
    p1 = jnp.asarray(p1, jnp.float32)
    p2 = jnp.asarray(p2, jnp.float32)
    C = p1.shape[1]
    grade = int(grade)
    xs = _pi_0(_pi_0(p1)[:, :, None] * _pi_0(p2)[:, None, :]) ** grade
    c1 = jnp.arange(C)[:, None]
    c2 = jnp.arange(C)[None, :]
    if task == "addition":
        tgt = c1 + c2
    elif task == "product":
        tgt = c1 * c2
    elif task == "multiop":
        tgt = c1 * c1 + c2 * c2 + c1 * c2
    else:
        raise ValueError(task)
    mask = tgt[None, :, :] == labels.astype(jnp.int32)[:, None, None]
    num = jnp.sum(jnp.where(mask, xs, 0.0), axis=(1, 2))
    cnt = jnp.sum(mask, axis=(1, 2)).astype(jnp.float32)
    pm = num / jnp.where(cnt > 0, cnt, 1.0)
    exists = jnp.where(cnt > 0, pm ** (1.0 / grade), 0.0)
    err = (1.0 - _pi_1(exists)) ** 2
    return jnp.sqrt(jnp.mean(err))


# ---------------------------------------------------------------------------
# Module wrapper mirroring ADDMNIST_SAT_AGG.forward
# ---------------------------------------------------------------------------
class ADDMNIST_SAT_AGG:
    def __init__(self, loss, task="addition", nr_classes=19):
        self.base_loss = loss
        self.task = task
        if task == "addition":
            self.nr_classes = 19
        elif task == "product":
            self.nr_classes = 81
        elif task == "multiop":
            self.nr_classes = 15
        self.grade = 1

    def update_grade(self, epoch):
        if epoch % 3 == 0 and epoch != 0:
            self.grade += 2 if self.grade < 10 else 0

    def forward(self, out_dict, args):
        loss, losses = self.base_loss(out_dict, args)
        Ys = out_dict["LABELS"]
        pCs = out_dict["pCS"]
        prob_digit1, prob_digit2 = pCs[:, 0, :], pCs[:, 1, :]
        sat_loss = sat_agg_loss_pallas(prob_digit1, prob_digit2, Ys,
                                       grade=self.grade, task=self.task)
        # Keep the sat-loss as a device scalar (no per-step .item()/float() host sync);
        # convert to a Python float only when actually logging.
        losses.update({"sat-loss": sat_loss})
        return loss + sat_loss, losses


if __name__ == "__main__":
    key = jax.random.PRNGKey(0)
    k1, k2, k3, k4, k5 = jax.random.split(key, 5)

    # --- Case 1: module forward path (addition, grade=1, single-shot kernel) ---
    B, C = 8, 10
    logits = jax.random.normal(k1, (B, 2, C), dtype=jnp.float32)
    pCs = jax.nn.softmax(logits, axis=-1)
    labels = jax.random.randint(k2, (B,), 0, 19, dtype=jnp.int32)

    # TODO(synk): base_loss is an externally injected torch module (e.g. ADDMNIST ELBO);
    # using a deterministic zero stub since it is not part of this module's definition.
    def zero_base_loss(out_dict, args):
        return jnp.float32(0.0), {}

    module = ADDMNIST_SAT_AGG(zero_base_loss, task="addition")
    total, losses = module.forward({"LABELS": labels, "pCS": pCs}, args=None)
    total = jax.block_until_ready(total)
    ref = sat_agg_loss_ref(pCs[:, 0, :], pCs[:, 1, :], labels, 1, "addition")
    assert jnp.isfinite(total)
    assert jnp.allclose(total, ref, atol=2e-5, rtol=2e-5), (float(total), float(ref))

    # --- Case 2: grade > 2 (exp/log root path), same inputs ---
    out2 = sat_agg_loss_pallas(pCs[:, 0, :], pCs[:, 1, :], labels, grade=3, task="addition")
    ref2 = sat_agg_loss_ref(pCs[:, 0, :], pCs[:, 1, :], labels, 3, "addition")
    assert jnp.allclose(out2, ref2, atol=2e-5, rtol=2e-5), (float(out2), float(ref2))

    # --- Case 3: product task with (possibly unrealizable) labels, grade=2 ---
    lab_p = jax.random.randint(k3, (B,), 0, 81, dtype=jnp.int32)
    out3 = sat_agg_loss_pallas(pCs[:, 0, :], pCs[:, 1, :], lab_p, grade=2, task="product")
    ref3 = sat_agg_loss_ref(pCs[:, 0, :], pCs[:, 1, :], lab_p, 2, "product")
    assert jnp.allclose(out3, ref3, atol=2e-5, rtol=2e-5), (float(out3), float(ref3))

    # --- Case 4: batch-tiled accumulating path (parallel axis + grid over B + padding) ---
    B2 = 20
    pCs2 = jax.nn.softmax(jax.random.normal(k4, (B2, 2, C), dtype=jnp.float32), axis=-1)
    lab_m = jax.random.randint(k5, (B2,), 0, 15, dtype=jnp.int32)
    out4 = sat_agg_loss_pallas(pCs2[:, 0, :], pCs2[:, 1, :], lab_m,
                               grade=5, task="multiop", block_b=8)
    out4 = jax.block_until_ready(out4)
    ref4 = sat_agg_loss_ref(pCs2[:, 0, :], pCs2[:, 1, :], lab_m, 5, "multiop")
    assert jnp.allclose(out4, ref4, atol=2e-5, rtol=2e-5), (float(out4), float(ref4))

    print("KERNEL_OK")
</pallas_src>

<mosaic_0001>
module attributes {stable_mosaic.version = 11 : i64} {
  func.func @_sat_agg_kernel(%arg0: memref<3x10x100xf32, #tpu.memory_space<vmem>>, %arg1: memref<8x10xf32, #tpu.memory_space<vmem>>, %arg2: memref<8x10xf32, #tpu.memory_space<vmem>>, %arg3: memref<8x2xf32, #tpu.memory_space<vmem>>, %arg4: memref<1x1xf32, #tpu.memory_space<vmem>>) attributes {dimension_semantics = [], scalar_prefetch = 0 : i64, scratch_operands = 0 : i64, tpu.core_type = #tpu.core_type<tc>} {
    %c0 = arith.constant 0 : index
    %c0_0 = arith.constant 0 : index
    %c0_1 = arith.constant 0 : index
    %0 = vector.load %arg0[%c0, %c0_0, %c0_1] : memref<3x10x100xf32, #tpu.memory_space<vmem>>, vector<1x10x100xf32>
    %1 = vector.shape_cast %0 : vector<1x10x100xf32> to vector<10x100xf32>
    %2 = vector.extract_strided_slice %1 {offsets = [0, 0], sizes = [1, 100], strides = [1, 1]} : vector<10x100xf32> to vector<1x100xf32>
    %c1 = arith.constant 1 : index
    %c0_2 = arith.constant 0 : index
    %c0_3 = arith.constant 0 : index
    %3 = vector.load %arg0[%c1, %c0_2, %c0_3] : memref<3x10x100xf32, #tpu.memory_space<vmem>>, vector<1x10x100xf32>
    %4 = vector.shape_cast %3 : vector<1x10x100xf32> to vector<10x100xf32>
    %c2 = arith.constant 2 : index
    %c0_4 = arith.constant 0 : index
    %c0_5 = arith.constant 0 : index
    %5 = vector.load %arg0[%c2, %c0_4, %c0_5] : memref<3x10x100xf32, #tpu.memory_space<vmem>>, vector<1x10x100xf32>
    %6 = vector.shape_cast %5 : vector<1x10x100xf32> to vector<10x100xf32>
    %c0_6 = arith.constant 0 : index
    %c0_7 = arith.constant 0 : index
    %7 = vector.load %arg1[%c0_6, %c0_7] : memref<8x10xf32, #tpu.memory_space<vmem>>, vector<8x10xf32>
    %c0_8 = arith.constant 0 : index
    %c0_9 = arith.constant 0 : index
    %8 = vector.load %arg2[%c0_8, %c0_9] : memref<8x10xf32, #tpu.memory_space<vmem>>, vector<8x10xf32>
    %c0_10 = arith.constant 0 : index
    %c0_11 = arith.constant 0 : index
    %9 = vector.load %arg3[%c0_10, %c0_11] : memref<8x2xf32, #tpu.memory_space<vmem>>, vector<8x2xf32>
    %10 = vector.extract_strided_slice %9 {offsets = [0, 0], sizes = [8, 1], strides = [1, 1]} : vector<8x2xf32> to vector<8x1xf32>
    %11 = vector.extract_strided_slice %9 {offsets = [0, 1], sizes = [8, 1], strides = [1, 1]} : vector<8x2xf32> to vector<8x1xf32>
    %cst = arith.constant 0.999899983 : f32
    %12 = vector.broadcast %cst : f32 to vector<8x10xf32>
    %13 = arith.mulf %12, %7 : vector<8x10xf32>
    %cst_12 = arith.constant 9.99999974E-5 : f32
    %14 = vector.broadcast %cst_12 : f32 to vector<8x10xf32>
    %15 = arith.addf %13, %14 : vector<8x10xf32>
    %cst_13 = arith.constant 0.999899983 : f32
    %16 = vector.broadcast %cst_13 : f32 to vector<8x10xf32>
    %17 = arith.mulf %16, %8 : vector<8x10xf32>
    %cst_14 = arith.constant 9.99999974E-5 : f32
    %18 = vector.broadcast %cst_14 : f32 to vector<8x10xf32>
    %19 = arith.addf %17, %18 : vector<8x10xf32>
    %cst_15 = arith.constant dense<0.000000e+00> : vector<8x100xf32>
    %20 = tpu.matmul %15, %4, %cst_15 {dimension_numbers = #tpu.dot_dimension_numbers<[1], [0], [0], [1], [0, 0, 1, 1], [], []>} : vector<8x10xf32>, vector<10x100xf32>, vector<8x100xf32> -> vector<8x100xf32>
    %cst_16 = arith.constant dense<0.000000e+00> : vector<8x100xf32>
    %21 = tpu.matmul %19, %6, %cst_16 {dimension_numbers = #tpu.dot_dimension_numbers<[1], [0], [0], [1], [0, 0, 1, 1], [], []>} : vector<8x10xf32>, vector<10x100xf32>, vector<8x100xf32> -> vector<8x100xf32>
    %22 = arith.mulf %20, %21 : vector<8x100xf32>
    %cst_17 = arith.constant 0.999899983 : f32
    %23 = vector.broadcast %cst_17 : f32 to vector<8x100xf32>
    %24 = arith.mulf %23, %22 : vector<8x100xf32>
    %cst_18 = arith.constant 9.99999974E-5 : f32
    %25 = vector.broadcast %cst_18 : f32 to vector<8x100xf32>
    %26 = arith.addf %24, %25 : vector<8x100xf32>
    %27 = vector.broadcast %2 : vector<1x100xf32> to vector<8x100xf32>
    %28 = vector.broadcast %10 : vector<8x1xf32> to vector<8x100xf32>
    %29 = arith.cmpf oeq, %27, %28 : vector<8x100xf32>
    %cst_19 = arith.constant 0.000000e+00 : f32
    %30 = vector.broadcast %cst_19 : f32 to vector<8x100xf32>
    %31 = arith.select %29, %26, %30 : vector<8x100xi1>, vector<8x100xf32>
    %cst_20 = arith.constant dense<0.000000e+00> : vector<8xf32>
    %32 = vector.multi_reduction <add>, %31, %cst_20 [1] : vector<8x100xf32> to vector<8xf32>
    %33 = vector.shape_cast %32 : vector<8xf32> to vector<8x1xf32>
    %cst_21 = arith.constant 0.000000e+00 : f32
    %34 = vector.broadcast %cst_21 : f32 to vector<8x1xf32>
    %35 = arith.cmpf ogt, %11, %34 : vector<8x1xf32>
    %36 = arith.mulf %33, %11 : vector<8x1xf32>
    %cst_22 = arith.constant 0.000000e+00 : f32
    %37 = vector.broadcast %cst_22 : f32 to vector<8x1xf32>
    %38 = arith.select %35, %36, %37 : vector<8x1xi1>, vector<8x1xf32>
    %cst_23 = arith.constant 0.999899983 : f32
    %39 = vector.broadcast %cst_23 : f32 to vector<8x1xf32>
    %40 = arith.mulf %39, %38 : vector<8x1xf32>
    %cst_24 = arith.constant 1.000000e+00 : f32
    %41 = vector.broadcast %cst_24 : f32 to vector<8x1xf32>
    %42 = arith.subf %41, %40 : vector<8x1xf32>
    %43 = arith.mulf %42, %42 : vector<8x1xf32>
    %cst_25 = arith.constant dense<0.000000e+00> : vector<1xf32>
    %44 = vector.multi_reduction <add>, %43, %cst_25 [0] : vector<8x1xf32> to vector<1xf32>
    %45 = vector.shape_cast %44 : vector<1xf32> to vector<1x1xf32>
    %c0_26 = arith.constant 0 : index
    %c0_27 = arith.constant 0 : index
    %46 = vector.load %arg4[%c0_26, %c0_27] : memref<1x1xf32, #tpu.memory_space<vmem>>, vector<1x1xf32>
    tpu.vector_store %arg4[%c0_26, %c0_27], %45 {strides = array<i32>} : memref<1x1xf32, #tpu.memory_space<vmem>>, vector<1x1xf32>,
    return
  }
}

</mosaic_0001>

<bundles_post_ra>
// kernel: sat_agg_loss_pallas.1
= control target key start
LH: loop header
LB: loop body
LE: loop exit
PB: predicated region body
PF: predicated region fallthrough
CT: control target
= control target key end

     0   :  { %vm36_vm0 = vcmask 1041408   ;;  %v175_v8 = vmov 0   ;;  %vm32_vm1 = vcmask 80896   ;;  %s230_s0 = inlined_call_operand.vmem [shape: f32[3,10,100], index: 0, kind: input, shape index: {}]   ;;  %s231_s1 = inlined_call_operand.vmem [shape: f32[8,10], index: 1, kind: input, shape index: {}]   ;;  %s232_s2 = inlined_call_operand.vmem [shape: f32[8,10], index: 2, kind: input, shape index: {}]   ;;  %s233_s3 = inlined_call_operand.vmem [shape: f32[8,2], index: 3, kind: input, shape index: {}]   ;;  %s234_s4 = inlined_call_operand.hbm [shape: f32[1,1], index: 4, kind: output, shape index: {}]  }
   0x1   :  { %v138_v0 = vld [vmem:[%s230_s0 + $0x18] sm:$0x3]  ;;  %v140_v1 = vld [vmem:[%s230_s0 + $0x28] sm:$0x3]  ;;  %v137_v2 = vld [vmem:[%s230_s0 + $0x10] sm:$0xff]  ;;  %148 = vset.pattern.permute.xlu0 %v175_v8 }
   0x2   :  { %141 = vmatpush.msk.msra.mxu0 %vm36_vm0, %v138_v0  ;;  %143 = vmatpush.msk.msra.mxu1 %vm36_vm0, %v140_v1  ;;  %v139_v3 = vld [vmem:[%s230_s0 + $0x20] sm:$0xff] }
   0x3   :  { %v25_v4 = vld [vmem:[%s231_s1] sm:$0xff] }
   0x4   :  { %v26_v5 = vld [vmem:[%s232_s2] sm:$0xff]  ;;  %v28_v6 = vmul.f32 0.9999, %v25_v4  ;;  %55 = vmatpush.msra.mxu0 %v137_v2  ;;  %81 = vmatpush.msra.mxu1 %v139_v3 }
   0x5   :  { %v30_v7 = vmul.f32 0.9999, %v26_v5  ;;  %v27_v9 = vld [vmem:[%s233_s3] sm:$0xff] }
   0x6   :  { %9 = vsyncpa [#allocation3], 0  ;;  %v29_v10 = vadd.f32 0.0001, %v28_v6  ;;  %92 = vperm.xlu0 %148, %v27_v9   ;;  %v18_v12 = vld [vmem:[%s230_s0] sm:$0xff]  ;;  %vm97_vm3 = vcmask 818176  }
   0x7   :  { %v31_v11 = vadd.f32 0.0001, %v30_v7  ;;  %v89_v15 = vperm.slane %v18_v12, 0  ;;  %vm101_vm4 = vcmp.gt.f32.partialorder %v27_v9, 0.0  ;;  %vm107_vm5 = vcmask 15368   ;;  %s176_s0 = smov 127  }
   0x8   :  { %142 = vmatmul.msk.f32.vlgmr.msra.gmra.mxu0 %vm32_vm1, %v29_v10  ;;  %s177_s2 = smov [#allocation2]   ;;  %s128_s6 = sshll.u32 %s234_s4, 4  ;;  %vm119_vm6 = vcmask 0   ;;  %s129_s6 = int_to_ptr.hbm [resolvable:$true] %s128_s6 }
   0x9   :  { %144 = vmatmul.msk.f32.vlgmr.msra.gmra.mxu1 %vm32_vm1, %v31_v11  ;;  %s126_s3 = sshll.u32 %s177_s2, 4  ;;  %s127_s3 = int_to_ptr.vmem [resolvable:$true] %s126_s3 }
  0x78   :  { %v93_v17 = vpop.permute.xlu0 %92 }
  0x79   :  { %vm95_vm2 = vcmp.eq.f32.partialorder %v89_v15, %v93_v17 }
  0x85   :  { %v57_v13 = vpop.f32.mrf.mxu0 }
  0x86   :  { %v83_v14 = vpop.f32.mrf.mxu1 }
  0x87   :  { %v86_v16 = vmul.f32 %v83_v14, %v57_v13 }
  0x89   :  { %v87_v18 = vmul.f32 0.9999, %v86_v16 }
  0x8b   :  { %v88_v19 = vadd.f32 0.0001, %v87_v18 }
  0x8d   :  { %v96_v20 = vsel %vm95_vm2, %v88_v19, 0.0 }
  0x8e   :  { %v98_v21 = vsel %vm97_vm3, %v96_v20, 0.0 }
  0x8f   :  { %99 = vadd.xlane.f32.xlu0 %v98_v21 }
 0x102   :  { %v100_v22 = vpop.xlane.xlu0 %99 }
 0x103   :  { %v102_v23 = vmul.f32 %v100_v22, %v27_v9 }
 0x105   :  { %v103_v24 = vsel %vm101_vm4, %v102_v23, 0.0 }
 0x106   :  { %v104_v25 = vmul.f32 0.9999, %v103_v24 }
 0x108   :  { %v105_v26 = vsub.f32 1.0, %v104_v25 }
 0x10a   :  { %v106_v27 = vmul.f32 %v105_v26, %v105_v26 }
 0x10c   :  { %v108_v28 = vsel %vm107_vm5, %v106_v27, 0.0 }
 0x10d   :  { %v109_v29 = vrot.slane %v108_v28, 4 }
 0x10f   :  { %v110_v30 = vadd.f32 %v109_v29, %v108_v28 }
 0x111   :  { %v111_v31 = vrot.slane %v110_v30, 2 }
 0x113   :  { %v112_v32 = vadd.f32 %v111_v31, %v110_v30 }
 0x115   :  { %v113_v33 = vrot.slane %v112_v32, 1 }
 0x117   :  { %v114_v34 = vadd.f32 %v113_v33, %v112_v32 }
 0x119   :  { %116 = vrot.lane.b32.xlu1 %v114_v34, %s176_s0 }
 0x18b   :  { %v117_v35 = vpop.permute.xlu1 %116 }
 0x18c   :  { %120 = vst.msk [vmem:[#allocation2] sm:$0x1] %vm119_vm6, %v117_v35 }
 0x18d   :  { %131 = dma.vmem_to_hbm [thread:$0]  %s127_s3, 16, %s129_s6, [#allocation3]  }
 0x18e   :  { %173 = dma.done.wait [#allocation3], 16  }
 0x18f   :  { %174 = vsyncadd [#allocation3], 4294967280 }
 0x190   :  { %136 = vsyncpa [#allocation3], 1 }

</bundles_post_ra>
